<compile_context>
chip_gen: v7x
topology: tpu7x:2x2x1
jax: 0.10.0
libtpu: 0.0.40
codegen_flags: <defaults>
</compile_context>

<pallas_src>
import functools

import jax
import jax.numpy as jnp
from jax import lax
from jax.experimental import pallas as pl
from jax.experimental.pallas import tpu as pltpu


# --------------------------------------------------------------------------- #
# Kernel 1: scorer  ==  Linear(D, 256) -> ReLU -> Linear(256, 1) -> Sigmoid
#   Tiled over the M = B*T row axis; weights stay resident in VMEM.
# --------------------------------------------------------------------------- #
def _scorer_kernel(x_ref, w1_ref, b1_ref, w2_ref, b2_ref, s_ref):
    # x_ref: (TM, D) f32, w1_ref: (D, H) bf16, b1_ref: (1, H) f32,
    # w2_ref: (1, H) f32 (row form of the (H, 1) weight), b2_ref: (1, 1) f32 in SMEM,
    # s_ref: (TM, 1) f32
    x_bf = x_ref[...].astype(jnp.bfloat16)
    h = jnp.dot(x_bf, w1_ref[...], preferred_element_type=jnp.float32)
    h = jnp.maximum(h + b1_ref[...], 0.0)
    # out_features == 1: broadcast-mul + lane reduction instead of an N=1 matmul
    z = jnp.sum(h * w2_ref[...], axis=1, keepdims=True) + b2_ref[0, 0]
    s_ref[...] = 1.0 / (1.0 + jnp.exp(-z))


def scorer_pallas(x2d, w1_bf16, b1, w2_row, b2, *, tm=512):
    m, d = x2d.shape
    h = w1_bf16.shape[1]
    tm = min(tm, m)                      # tm == m (full) or a multiple-of-8 tile
    grid = (pl.cdiv(m, tm),)
    return pl.pallas_call(
        _scorer_kernel,
        out_shape=jax.ShapeDtypeStruct((m, 1), jnp.float32),
        grid=grid,
        in_specs=[
            pl.BlockSpec((tm, d), lambda i: (i, 0)),          # activations: streamed
            pl.BlockSpec((d, h), lambda i: (0, 0)),           # W1 (bf16): resident
            pl.BlockSpec((1, h), lambda i: (0, 0)),           # b1: resident
            pl.BlockSpec((1, h), lambda i: (0, 0)),           # w2 row: resident
            pl.BlockSpec(memory_space=pltpu.MemorySpace.SMEM),  # b2 scalar in SMEM
        ],
        out_specs=pl.BlockSpec((tm, 1), lambda i: (i, 0)),
        compiler_params=pltpu.CompilerParams(dimension_semantics=("parallel",)),
    )(x2d, w1_bf16, b1, w2_row, b2)


# --------------------------------------------------------------------------- #
# Kernel 2: per-time-step sum over batch of perturbed-top-k indicators
#   colsum[t] = sum_b mean_n 1[score_{b,t} + sigma*noise_{b,t,n} in top-k of sample n]
#   Grid over B; (T, 1) output block stays resident and is accumulated into.
# --------------------------------------------------------------------------- #
def _colsum_kernel(scores_ref, noise_ref, colsum_ref, pert_ref, *, t, n, k, sigma):
    b = pl.program_id(0)

    @pl.when(b == 0)
    def _():
        colsum_ref[...] = jnp.zeros_like(colsum_ref)

    # Perturbed scores for this batch element: (T, N), N on lanes.
    pert_ref[...] = scores_ref[0] + sigma * noise_ref[0]
    pert = pert_ref[...]

    # counts[j, s] = #{m : pert[m, s] > pert[j, s]}  (strict rank of element j)
    def body(m, counts):
        row = pert_ref[pl.ds(m, 1), :]                     # (1, N) row m
        return counts + (row > pert).astype(jnp.float32)

    counts = lax.fori_loop(0, t, body, jnp.zeros((t, n), jnp.float32),
                           unroll=bool(t <= 16))
    # element j is in the top-k of sample s iff fewer than k elements beat it
    ind = (counts < float(k)).astype(jnp.float32)          # (T, N)
    colsum_ref[...] += jnp.mean(ind, axis=1, keepdims=True)  # (T, 1)


def colsum_pallas(scores_bt1, noise_btn, k_int, sigma):
    bsz, t, _ = scores_bt1.shape
    n = noise_btn.shape[-1]
    kern = functools.partial(_colsum_kernel, t=t, n=n, k=k_int, sigma=sigma)
    return pl.pallas_call(
        kern,
        out_shape=jax.ShapeDtypeStruct((t, 1), jnp.float32),
        grid=(bsz,),
        in_specs=[
            pl.BlockSpec((1, t, 1), lambda b: (b, 0, 0)),
            pl.BlockSpec((1, t, n), lambda b: (b, 0, 0)),
        ],
        out_specs=pl.BlockSpec((t, 1), lambda b: (0, 0)),
        scratch_shapes=[pltpu.VMEM((t, n), jnp.float32)],
        compiler_params=pltpu.CompilerParams(dimension_semantics=("arbitrary",)),
    )(scores_bt1, noise_btn)


# --------------------------------------------------------------------------- #
# Kernel 3: streamed combine  out[b, t, :] = x[b, t, :] * colsum[t]
#   (exactly torch's  (topk[:, :, None] * x[:, None]).sum(dim=1))
# --------------------------------------------------------------------------- #
def _combine_kernel(x_ref, colsum_ref, out_ref):
    # x_ref/out_ref: (1, TT, D); colsum_ref: (TT, 1) -> single lane broadcast per step
    out_ref[0] = (x_ref[0] * colsum_ref[...]).astype(out_ref.dtype)


def combine_pallas(x, colsum_t1, *, tt=512):
    bsz, t, d = x.shape
    tt = min(tt, t)                      # tt == t (full) or a multiple-of-8 tile
    return pl.pallas_call(
        _combine_kernel,
        out_shape=jax.ShapeDtypeStruct((bsz, t, d), x.dtype),
        grid=(bsz, pl.cdiv(t, tt)),
        in_specs=[
            pl.BlockSpec((1, tt, d), lambda b, ti: (b, ti, 0)),
            pl.BlockSpec((tt, 1), lambda b, ti: (ti, 0)),
        ],
        out_specs=pl.BlockSpec((1, tt, d), lambda b, ti: (b, ti, 0)),
        compiler_params=pltpu.CompilerParams(
            dimension_semantics=("parallel", "parallel")),
    )(x, colsum_t1)


# --------------------------------------------------------------------------- #
# Module wrapper (deterministic synthetic parameter init, JAX glue only)
# --------------------------------------------------------------------------- #
class HardAttentionPallas:
    def __init__(self, k, num_samples, in_dim=512, sigma=0.05, key=None):
        key = jax.random.PRNGKey(0) if key is None else key
        k1, k2, k3, k4 = jax.random.split(key, 4)
        hid = 256
        lim1 = 1.0 / (in_dim ** 0.5)
        lim2 = 1.0 / (hid ** 0.5)
        self.w1 = jax.random.uniform(k1, (in_dim, hid), jnp.float32, -lim1, lim1)
        self.w1_bf16 = self.w1.astype(jnp.bfloat16)      # cast once; halves W1 DMA
        self.b1 = jax.random.uniform(k2, (1, hid), jnp.float32, -lim1, lim1)
        # second linear weight (hid, 1) stored as a (1, hid) row
        self.w2 = jax.random.uniform(k3, (1, hid), jnp.float32, -lim2, lim2)
        self.b2 = jax.random.uniform(k4, (1, 1), jnp.float32, -lim2, lim2)
        self.k = k
        self.num_samples = num_samples
        self.sigma = sigma

    def __call__(self, x, noise_key):
        bsz, t, d = x.shape
        # --- scorer (Pallas, tiled over B*T rows) ---
        scores = scorer_pallas(x.reshape(bsz * t, d),
                               self.w1_bf16, self.b1, self.w2, self.b2)
        scores_bt = scores.reshape(bsz, t)
        # --- k resolution, exactly as PerturbedTopKFunction.forward ---
        k_int = int(t * self.k)
        if k_int > t:
            k_int = t
        elif k_int == 0:
            k_int = 1
        train_mode = bsz > 1
        if not train_mode:
            k_int = min(1000, k_int)
        # torch draws noise of shape (B, num_samples, T); we draw the same iid
        # distribution laid out as (B, T, N) so the sample axis N sits on lanes.
        noise = jax.random.normal(noise_key, (bsz, t, self.num_samples), jnp.float32)
        # --- perturbed top-k, reduced over batch (Pallas) ---
        colsum = colsum_pallas(scores.reshape(bsz, t, 1), noise, k_int, self.sigma)
        # --- streamed combine x * colsum (Pallas) ---
        out = combine_pallas(x, colsum)
        return out, scores_bt, noise, k_int


# Pure-JAX reference (fed with the kernel-produced scores so perturbed values
# are bit-identical and no tie can flip).
def _reference_from_scores(scores_bt, noise_btn, x, k_int, sigma):
    pert = scores_bt[:, :, None] + sigma * noise_btn           # (B, T, N)
    gt = pert[:, :, None, :] > pert[:, None, :, :]             # gt[b, m, j, n]
    counts = jnp.sum(gt.astype(jnp.float32), axis=1)           # (B, T, N)
    ind = (counts < k_int).astype(jnp.float32)
    indicators = jnp.mean(ind, axis=2)                         # (B, T)
    colsum = jnp.sum(indicators, axis=0)                       # (T,)
    return x * colsum[None, :, None]


if __name__ == "__main__":
    B, T, D = 2, 8, 128
    key = jax.random.PRNGKey(0)
    kx, kn, kp = jax.random.split(key, 3)
    x = jax.random.normal(kx, (B, T, D), jnp.float32)

    mod = HardAttentionPallas(k=0.5, num_samples=128, in_dim=D, key=kp)
    out, scores_bt, noise, k_int = mod(x, kn)
    out = jax.block_until_ready(out)

    assert out.shape == (B, T, D)
    ref = _reference_from_scores(scores_bt, noise, x, k_int, mod.sigma)
    assert jnp.allclose(out, ref, atol=1e-4, rtol=1e-4), float(jnp.max(jnp.abs(out - ref)))
    print("KERNEL_OK")
</pallas_src>

<mosaic_0001>
module attributes {stable_mosaic.version = 11 : i64} {
  func.func @_scorer_kernel(%arg0: i32, %arg1: memref<16x128xf32, #tpu.memory_space<vmem>>, %arg2: memref<128x256xbf16, #tpu.memory_space<vmem>>, %arg3: memref<1x256xf32, #tpu.memory_space<vmem>>, %arg4: memref<1x256xf32, #tpu.memory_space<vmem>>, %arg5: memref<1x1xf32, #tpu.memory_space<smem>>, %arg6: memref<16x1xf32, #tpu.memory_space<vmem>>) attributes {dimension_semantics = [#tpu.dimension_semantics<parallel>], iteration_bounds = array<i64: 1>, scalar_prefetch = 0 : i64, scratch_operands = 0 : i64, tpu.core_type = #tpu.core_type<tc>, window_params = [{transform_indices = @transform_0, window_bounds = array<i64: 16, 128>}, {pipeline_mode = #tpu.pipeline_mode<synchronous>, transform_indices = @transform_1, window_bounds = array<i64: 128, 256>}, {pipeline_mode = #tpu.pipeline_mode<synchronous>, transform_indices = @transform_2, window_bounds = array<i64: 1, 256>}, {pipeline_mode = #tpu.pipeline_mode<synchronous>, transform_indices = @transform_3, window_bounds = array<i64: 1, 256>}, {transform_indices = @transform_4, window_bounds = array<i64: 1, 1>}, {transform_indices = @transform_5, window_bounds = array<i64: 16, 1>}]} {
    %c0 = arith.constant 0 : index
    %c0_0 = arith.constant 0 : index
    %0 = vector.load %arg1[%c0, %c0_0] : memref<16x128xf32, #tpu.memory_space<vmem>>, vector<16x128xf32>
    %1 = arith.truncf %0 : vector<16x128xf32> to vector<16x128xbf16>
    %c0_1 = arith.constant 0 : index
    %c0_2 = arith.constant 0 : index
    %2 = vector.load %arg2[%c0_1, %c0_2] : memref<128x256xbf16, #tpu.memory_space<vmem>>, vector<128x256xbf16>
    %cst = arith.constant dense<0.000000e+00> : vector<16x256xf32>
    %3 = tpu.matmul %1, %2, %cst {dimension_numbers = #tpu.dot_dimension_numbers<[1], [0], [0], [1], [0, 0, 1, 1], [], []>} : vector<16x128xbf16>, vector<128x256xbf16>, vector<16x256xf32> -> vector<16x256xf32>
    %c0_3 = arith.constant 0 : index
    %c0_4 = arith.constant 0 : index
    %4 = vector.load %arg3[%c0_3, %c0_4] : memref<1x256xf32, #tpu.memory_space<vmem>>, vector<1x256xf32>
    %5 = vector.broadcast %4 : vector<1x256xf32> to vector<16x256xf32>
    %6 = arith.addf %3, %5 : vector<16x256xf32>
    %cst_5 = arith.constant 0.000000e+00 : f32
    %7 = vector.broadcast %cst_5 : f32 to vector<16x256xf32>
    %8 = arith.maximumf %6, %7 : vector<16x256xf32>
    %c0_6 = arith.constant 0 : index
    %c0_7 = arith.constant 0 : index
    %9 = vector.load %arg4[%c0_6, %c0_7] : memref<1x256xf32, #tpu.memory_space<vmem>>, vector<1x256xf32>
    %10 = vector.broadcast %9 : vector<1x256xf32> to vector<16x256xf32>
    %11 = arith.mulf %8, %10 : vector<16x256xf32>
    %cst_8 = arith.constant dense<0.000000e+00> : vector<16xf32>
    %12 = vector.multi_reduction <add>, %11, %cst_8 [1] : vector<16x256xf32> to vector<16xf32>
    %13 = vector.shape_cast %12 : vector<16xf32> to vector<16x1xf32>
    %c0_9 = arith.constant 0 : index
    %c0_10 = arith.constant 0 : index
    %14 = memref.load %arg5[%c0_9, %c0_10] : memref<1x1xf32, #tpu.memory_space<smem>>
    %15 = vector.broadcast %14 : f32 to vector<16x1xf32>
    %16 = arith.addf %13, %15 : vector<16x1xf32>
    %cst_11 = arith.constant 0.000000e+00 : f32
    %17 = vector.broadcast %cst_11 : f32 to vector<16x1xf32>
    %18 = arith.subf %17, %16 : vector<16x1xf32>
    %19 = math.exp %18 : vector<16x1xf32>
    %cst_12 = arith.constant 1.000000e+00 : f32
    %20 = vector.broadcast %cst_12 : f32 to vector<16x1xf32>
    %21 = arith.addf %20, %19 : vector<16x1xf32>
    %cst_13 = arith.constant 1.000000e+00 : f32
    %22 = vector.broadcast %cst_13 : f32 to vector<16x1xf32>
    %23 = arith.divf %22, %21 : vector<16x1xf32>
    %c0_14 = arith.constant 0 : index
    %c0_15 = arith.constant 0 : index
    %24 = vector.load %arg6[%c0_14, %c0_15] : memref<16x1xf32, #tpu.memory_space<vmem>>, vector<16x1xf32>
    tpu.vector_store %arg6[%c0_14, %c0_15], %23 {strides = array<i32>} : memref<16x1xf32, #tpu.memory_space<vmem>>, vector<16x1xf32>,
    return
  }
  func.func @transform_0(%arg0: i32) -> (i32, i32) {
    %c0_i32 = arith.constant 0 : i32
    %c0_i32_0 = arith.constant 0 : i32
    return %arg0, %c0_i32 : i32, i32
  }
  func.func @transform_1(%arg0: i32) -> (i32, i32) {
    %c0_i32 = arith.constant 0 : i32
    %c0_i32_0 = arith.constant 0 : i32
    %c0_i32_1 = arith.constant 0 : i32
    return %c0_i32, %c0_i32_0 : i32, i32
  }
  func.func @transform_2(%arg0: i32) -> (i32, i32) {
    %c0_i32 = arith.constant 0 : i32
    %c0_i32_0 = arith.constant 0 : i32
    %c0_i32_1 = arith.constant 0 : i32
    return %c0_i32, %c0_i32_0 : i32, i32
  }
  func.func @transform_3(%arg0: i32) -> (i32, i32) {
    %c0_i32 = arith.constant 0 : i32
    %c0_i32_0 = arith.constant 0 : i32
    %c0_i32_1 = arith.constant 0 : i32
    return %c0_i32, %c0_i32_0 : i32, i32
  }
  func.func @transform_4(%arg0: i32) -> (i32, i32) {
    %c0_i32 = arith.constant 0 : i32
    %c0_i32_0 = arith.constant 0 : i32
    %c0_i32_1 = arith.constant 0 : i32
    return %c0_i32, %c0_i32_0 : i32, i32
  }
  func.func @transform_5(%arg0: i32) -> (i32, i32) {
    %c0_i32 = arith.constant 0 : i32
    %c0_i32_0 = arith.constant 0 : i32
    return %arg0, %c0_i32 : i32, i32
  }
}

</mosaic_0001>

<bundles_post_ra>
// kernel: tpu_custom_call.1
= control target key start
LH: loop header
LB: loop body
LE: loop exit
PB: predicated region body
PF: predicated region fallthrough
CT: control target
= control target key end

     0   :  { %11 = vsyncpa [#allocation4], 0  ;;  %s430_s0 = inlined_call_operand.hbm [shape: f32[16,128], index: 0, kind: input, shape index: {}]   ;;  %s431_s1 = inlined_call_operand.hbm [shape: bf16[128,256], index: 1, kind: input, shape index: {}]   ;;  %s432_s2 = inlined_call_operand.vmem [shape: f32[1,256], index: 2, kind: input, shape index: {}]   ;;  %s433_s3 = inlined_call_operand.vmem [shape: f32[1,256], index: 3, kind: input, shape index: {}]   ;;  %s434_s4 = inlined_call_operand.<no memory space> [shape: f32[1,1], index: 4, kind: input, shape index: {}]   ;;  %s435_s5 = inlined_call_operand.vmem [shape: f32[16,1], index: 5, kind: output, shape index: {}]  }
   0x1   :  { %12 = vsyncpa [#allocation6], 0  ;;  %s356_s18 = smov [#allocation3]   ;;  %s308_s22 = scalar_lea.hbm %s430_s0, 256 }
   0x2   :  { %s18_s19 = sshll.u32 %s356_s18, 4  ;;  %p309_p0 = scmp.ne.s32.totalorder %s430_s0, %s308_s22  ;;  %s19_s19 = int_to_ptr.vmem [resolvable:$true] %s18_s19 }
   0x3   :  { %p312_p1 = scmp.lt.u32.totalorder %s308_s22, %s430_s0 }
   0x5   :  { %p314_p2 = pnand %p312_p1, %p309_p0 }
   0x7   :  { %317 = shalt.err (!%p314_p2)
}
   0x8   :  { %s318_s27 = scalar_lea.vmem %s19_s19, 256  ;;  %p323_p4 = scmp.lt.s32.totalorder %s19_s19, %s19_s19 }
   0x9   :  { %p319_p3 = scmp.ne.s32.totalorder %s19_s19, %s318_s27  ;;  %p324_p5 = scmp.lt.s32.totalorder %s318_s27, %s318_s27 }
   0xb   :  { %p325_p6 = por %p324_p5, %p323_p4 }
   0xd   :  { %p326_p7 = pnand %p325_p6, %p319_p3 }
   0xf   :  { %329 = shalt.err (!%p326_p7)
}
  0x10   :  { %s357_s28 = smov 128   ;;  %s358_s29 = smov 8  }
  0x11   :  { %24 = dma.hbm_to_vmem [thread:$0]  %s430_s0, 256, %s19_s19, [#allocation4], %s357_s28, %s357_s28, %s358_s29  }
  0x12   :  { %s359_s7 = smov [#allocation5]   ;;  %s330_s11 = scalar_lea.hbm %s431_s1, 2048 }
  0x13   :  { %s30_s8 = sshll.u32 %s359_s7, 4  ;;  %p331_p8 = scmp.ne.s32.totalorder %s431_s1, %s330_s11  ;;  %s31_s8 = int_to_ptr.vmem [resolvable:$true] %s30_s8 }
  0x14   :  { %p334_p9 = scmp.lt.u32.totalorder %s330_s11, %s431_s1 }
  0x16   :  { %p336_p10 = pnand %p334_p9, %p331_p8 }
  0x18   :  { %339 = shalt.err (!%p336_p10)
}
  0x19   :  { %s340_s16 = scalar_lea.vmem %s31_s8, 2048  ;;  %p345_p12 = scmp.lt.s32.totalorder %s31_s8, %s31_s8 }
  0x1a   :  { %p341_p11 = scmp.ne.s32.totalorder %s31_s8, %s340_s16  ;;  %p346_p13 = scmp.lt.s32.totalorder %s340_s16, %s340_s16 }
  0x1c   :  { %p347_p0 = por %p346_p13, %p345_p12 }
  0x1e   :  { %p348_p1 = pnand %p347_p0, %p341_p11 }
  0x20   :  { %351 = shalt.err (!%p348_p1)
}
  0x21   :  { %36 = dma.hbm_to_vmem [thread:$0]  %s431_s1, 2048, %s31_s8, [#allocation6], %s357_s28, %s357_s28, %s358_s29  }
  0x22   :  { %352 = dma.done.wait [#allocation4], 256  }
  0x23   :  { %353 = vsyncadd [#allocation4], 4294967040 }
  0x24   :  { %354 = dma.done.wait [#allocation6], 2048  }
  0x25   :  { %355 = vsyncadd [#allocation6], 4294965248  ;;  %v360_v0 = vmov 0   ;;  %v276_v1 = vld [vmem:[#allocation5 + $0x4] ss:$8 sps:$4 sm:$0xff]   ;;  %v50_v17 = vld [vmem:[#allocation3] sm:$0xff]  ;;  %v71_v20 = vlaneseq  ;;  %v231_v48 = vstv %s434_s4 }
  0x26   :  { %193 = vmatprep.mubr.bf16.mxu0 %v360_v0  ;;  %v278_v2 = vld [vmem:[#allocation5] ss:$8 sps:$4 sm:$0xff]   ;;  %161 = vmatprep.subr.bf16.mxu0 %v276_v1  ;;  %v279_v3 = vld [vmem:[#allocation5 + $0x14] ss:$8 sps:$4 sm:$0xff]   ;;  %v281_v4 = vld [vmem:[#allocation5 + $0x10] ss:$8 sps:$4 sm:$0xff]  }
  0x27   :  { %162 = vmatpush1.bf16.msra.mxu0 %v278_v2  ;;  %v282_v5 = vld [vmem:[#allocation5 + $0x24] ss:$8 sps:$4 sm:$0xff]   ;;  %v284_v6 = vld [vmem:[#allocation5 + $0x20] ss:$8 sps:$4 sm:$0xff]   ;;  %v285_v7 = vld [vmem:[#allocation5 + $0x34] ss:$8 sps:$4 sm:$0xff]  }
  0x28   :  { %163 = vmatprep.subr.bf16.mxu0 %v279_v3  ;;  %v287_v8 = vld [vmem:[#allocation5 + $0x30] ss:$8 sps:$4 sm:$0xff]   ;;  %v288_v9 = vld [vmem:[#allocation5 + $0x44] ss:$8 sps:$4 sm:$0xff]   ;;  %v290_v10 = vld [vmem:[#allocation5 + $0x40] ss:$8 sps:$4 sm:$0xff]  }
  0x29   :  { %v291_v11 = vld [vmem:[#allocation5 + $0x54] ss:$8 sps:$4 sm:$0xff]   ;;  %v293_v12 = vld [vmem:[#allocation5 + $0x50] ss:$8 sps:$4 sm:$0xff]   ;;  %v294_v13 = vld [vmem:[#allocation5 + $0x64] ss:$8 sps:$4 sm:$0xff]  }
  0x2a   :  { %v296_v14 = vld [vmem:[#allocation5 + $0x60] ss:$8 sps:$4 sm:$0xff]   ;;  %v297_v15 = vld [vmem:[#allocation5 + $0x74] ss:$8 sps:$4 sm:$0xff]   ;;  %v299_v16 = vld [vmem:[#allocation5 + $0x70] ss:$8 sps:$4 sm:$0xff]  }
  0x2b   :  { %164 = vmatpush1.bf16.msra.mxu0 %v281_v4  ;;  %v51_v18 = vld [vmem:[#allocation3 + $0x8] sm:$0xff]  ;;  %v72_v21 = vshrl.u32 %v71_v20, 7  ;;  %v69_v23 = vld [vmem:[%s432_s2] sm:$0x3]  ;;  %vm246_vm0 = vcmask 7168  }
  0x2c   :  { %165 = vmatprep.subr.bf16.mxu0 %v282_v5  ;;  %v52_v19 = vpack.c.bf16 %v51_v18, %v50_v17  ;;  %v208_v27 = vld [vmem:[%s433_s3] sm:$0x3] }
  0x2d   :  { %v73_v22 = vsub.s32 0, %v72_v21  ;;  %v77_v24 = vsub.s32 1, %v72_v21 }
  0x2f   :  { %166 = vmatpush1.bf16.msra.mxu0 %v284_v6  ;;  %v74_v25 = vrot.slane %v69_v23, %v73_v22  ;;  %v78_v26 = vrot.slane %v69_v23, %v77_v24  ;;  %v213_v31 = vrot.slane %v208_v27, %v73_v22  ;;  %v217_v34 = vrot.slane %v208_v27, %v77_v24 }
  0x30   :  { %167 = vmatprep.subr.bf16.mxu0 %v285_v7 }
  0x33   :  { %168 = vmatpush1.bf16.msra.mxu0 %v287_v8 }
  0x34   :  { %169 = vmatprep.subr.bf16.mxu0 %v288_v9 }
  0x37   :  { %170 = vmatpush1.bf16.msra.mxu0 %v290_v10 }
  0x38   :  { %171 = vmatprep.subr.bf16.mxu0 %v291_v11 }
  0x3b   :  { %172 = vmatpush1.bf16.msra.mxu0 %v293_v12 }
  0x3c   :  { %173 = vmatprep.subr.bf16.mxu0 %v294_v13 }
  0x3f   :  { %174 = vmatpush1.bf16.msra.mxu0 %v296_v14 }
  0x40   :  { %175 = vmatprep.subr.bf16.mxu0 %v297_v15 }
  0x43   :  { %176 = vmatpush1.bf16.msra.mxu0 %v299_v16 }
  0x46   :  { %194 = vmatmul.mubr.bf16.vlgmr.msra.gmra.mrb[0].mxu0 %v52_v19 }
 0x119   :  { %v195_v28 = vpop.f32.mrb[0].mxu0 }
 0x11a   :  { %v196_v29 = vadd.f32 %v195_v28, %v74_v25  ;;  %v197_v30 = vpop.f32.mrb[1].mxu0 }
 0x11b   :  { %v198_v32 = vadd.f32 %v197_v30, %v78_v26  ;;  %v199_v33 = vpop.f32.mrb[2].mxu0 }
 0x11c   :  { %v204_v35 = vmax.f32 %v196_v29, 0.0  ;;  %v200_v36 = vadd.f32 %v199_v33, %v74_v25  ;;  %v201_v37 = vpop.f32.mrb[3].mxu0 }
 0x11d   :  { %v205_v38 = vmax.f32 %v198_v32, 0.0  ;;  %v202_v39 = vadd.f32 %v201_v37, %v78_v26 }
 0x11e   :  { %v206_v40 = vmax.f32 %v200_v36, 0.0  ;;  %v220_v41 = vmul.f32 %v213_v31, %v204_v35 }
 0x11f   :  { %v207_v42 = vmax.f32 %v202_v39, 0.0  ;;  %v221_v43 = vmul.f32 %v217_v34, %v205_v38 }
 0x120   :  { %v222_v44 = vmul.f32 %v213_v31, %v206_v40 }
 0x121   :  { %v223_v45 = vmul.f32 %v217_v34, %v207_v42  ;;  %v224_v46 = vadd.f32 %v221_v43, %v220_v41 }
 0x123   :  { %225 = vadd.xlane.f32.xlu0 %v224_v46  ;;  %v227_v47 = vadd.f32 %v223_v45, %v222_v44 }
 0x127   :  { %228 = vadd.xlane.f32.xlu0 %v227_v47 }
 0x1b0   :  { %v226_v49 = vpop.xlane.xlu0 %225 }
 0x1b1   :  { %v232_v50 = vadd.f32 %v231_v48, %v226_v49 }
 0x1b3   :  { %v234_v51 = vsub.f32 0.0, %v232_v50 }
 0x1b4   :  { %v229_v52 = vpop.xlane.xlu0 %228 }
 0x1b5   :  { %v236_v53 = vmul.f32 1.442695, %v234_v51  ;;  %v233_v54 = vadd.f32 %v231_v48, %v229_v52 }
 0x1b7   :  { %300 = vpow2.f32 %v236_v53  ;;  %v235_v55 = vsub.f32 0.0, %v233_v54 }
 0x1b9   :  { %v238_v56 = vmul.f32 1.442695, %v235_v55 }
 0x1bb   :  { %302 = vpow2.f32 %v238_v56 }
 0x1c1   :  { %v301_v57 = vpop.eup %300 }
 0x1c2   :  { %v240_v58 = vadd.f32 1.0, %v301_v57 }
 0x1c4   :  { %304 = vrcp.f32 %v240_v58 }
 0x1c5   :  { %v303_v59 = vpop.eup %302 }
 0x1c6   :  { %v241_v60 = vadd.f32 1.0, %v303_v59 }
 0x1c8   :  { %306 = vrcp.f32 %v241_v60 }
 0x1ce   :  { %v305_v61 = vpop.eup %304 }
 0x1cf   :  { %247 = vst.msk [vmem:[%s435_s5] sm:$0xff] %vm246_vm0, %v305_v61 }
 0x1d2   :  { %v307_v62 = vpop.eup %306 }
 0x1d3   :  { %248 = vst.msk [vmem:[%s435_s5 + $0x8] sm:$0xff] %vm246_vm0, %v307_v62 }
 0x1d4   :  { %253 = vsyncpa [#allocation4], 1 }
 0x1d5   :  { %254 = vsyncpa [#allocation6], 1 }

</bundles_post_ra>
